<compile_context>
chip_gen: v7x
topology: tpu7x:2x2x1
jax: 0.10.0
libtpu: 0.0.40
codegen_flags: <defaults>
</compile_context>

<pallas_src>
import jax
import jax.numpy as jnp
from jax.experimental import pallas as pl
from jax.experimental.pallas import tpu as pltpu

# ---- model hyper-parameters (small, consistent with the module's forward) ----
B, S, T = 2, 8, 8          # batch, source length, target length
H, V = 32, 64              # config.hidden_size, config.vocab_size
NHEAD, FFN = 4, 64
MAX_POS = 64


def _round_up(x, m):
    return ((x + m - 1) // m) * m


# =======================  Pallas fused kernel  =======================
#   hidden = tanh(x @ W_dense + b)           (bf16 MXU inputs, f32 accumulate/elementwise)
#   logits = hidden @ E^T                    (tied lm_head; E^T pre-transposed in wrapper)
#   per-block partials: loss_part = sum(mask * (logsumexp(logits) - logits[label]))
#                       cnt_part  = sum(mask)

def _fused_lmhead_ce_kernel(x_ref, wd_ref, bd_ref, et_ref, lab_ref, msk_ref,
                            loss_ref, cnt_ref):
    # dense + tanh: bf16 in, f32 out; elementwise stays f32 (v5e has no bf16 VPU/EUP).
    h = jnp.tanh(
        jnp.dot(x_ref[...], wd_ref[...], preferred_element_type=jnp.float32)
        + bd_ref[...])                                                   # (tm, H) f32

    # tied lm_head: plain row-major dot against the pre-transposed (H, V) embedding.
    logits = jnp.dot(h.astype(jnp.bfloat16), et_ref[...],
                     preferred_element_type=jnp.float32)                 # (tm, V) f32
    # Vocab is unpadded (V equals the full array dim) -> no padded-column masking needed.

    tm, v = logits.shape
    col = jax.lax.broadcasted_iota(jnp.int32, (tm, v), 1)

    m = jnp.max(logits, axis=1, keepdims=True)                           # (tm, 1)
    lse = m + jnp.log(jnp.sum(jnp.exp(logits - m), axis=1, keepdims=True))
    # pick the label logit while the tile is live (no full-width log-prob temp)
    picked = jnp.sum(jnp.where(col == lab_ref[...], logits, 0.0),
                     axis=1, keepdims=True)                              # (tm, 1)

    msk = msk_ref[...]                                                   # (tm, 1) f32
    loss_part = jnp.sum((lse - picked) * msk)                            # scalar f32
    cnt_part = jnp.sum(msk)                                              # scalar f32

    # Per-block partials as lane-dense (8,128) one-hot tiles (unmasked vst; always
    # (8,128)-aligned regardless of the number of row blocks).  Wrapper jnp.sum's them,
    # so the row axis can be "parallel" (both v7x TensorCores) with no cross-step carry.
    r = jax.lax.broadcasted_iota(jnp.int32, (8, 128), 0)
    c = jax.lax.broadcasted_iota(jnp.int32, (8, 128), 1)
    sel = (r == 0) & (c == 0)
    loss_ref[...] = jnp.where(sel, loss_part, 0.0)
    cnt_ref[...] = jnp.where(sel, cnt_part, 0.0)


def fused_lmhead_masked_ce(x, w_dense, b_dense, emb, labels, mask, *, tm=256):
    """Fused tanh(dense(x)) -> tied lm_head -> masked cross-entropy partial reduction.

    x:       (N, H) f32       decoder hidden states (shifted rows)
    w_dense: (H, H) f32       dense weight (stored so the kernel does x @ w)
    b_dense: (1, H) f32
    emb:     (V, H) f32       tied word-embedding / lm_head weight
    labels:  (N,)   int32
    mask:    (N,)   f32       1.0 where the position is active
    Returns (loss_sum, active_count) scalars.
    """
    n, h = x.shape
    v = emb.shape[0]

    tm = min(tm, _round_up(n, 8))        # fill the MXU M-dim at scale, clamp at toy sizes
    n_pad = _round_up(n, tm)             # full row blocks only (padded rows are mask==0)
    nb = n_pad // tm

    # Row padding only; hidden/vocab stay unpadded (block last dims == full array dims).
    x_p = jnp.pad(x, ((0, n_pad - n), (0, 0))).astype(jnp.bfloat16)
    lab_p = jnp.pad(labels, (0, n_pad - n)).reshape(n_pad, 1)
    msk_p = jnp.pad(mask, (0, n_pad - n)).reshape(n_pad, 1)
    wd = w_dense.astype(jnp.bfloat16)
    bd = b_dense.reshape(1, h).astype(jnp.float32)
    et = emb.T.astype(jnp.bfloat16)      # (H, V): transposed ONCE by XLA, not per grid step

    loss_parts, cnt_parts = pl.pallas_call(
        _fused_lmhead_ce_kernel,
        out_shape=(jax.ShapeDtypeStruct((nb * 8, 128), jnp.float32),
                   jax.ShapeDtypeStruct((nb * 8, 128), jnp.float32)),
        grid=(nb,),
        in_specs=[
            pl.BlockSpec((tm, h), lambda i: (i, 0)),   # x rows: streamed / double-buffered
            pl.BlockSpec((h, h), lambda i: (0, 0)),    # W_dense: resident (constant index_map)
            pl.BlockSpec((1, h), lambda i: (0, 0)),    # bias: resident
            pl.BlockSpec((h, v), lambda i: (0, 0)),    # E^T: resident
            pl.BlockSpec((tm, 1), lambda i: (i, 0)),   # labels
            pl.BlockSpec((tm, 1), lambda i: (i, 0)),   # active mask
        ],
        out_specs=(pl.BlockSpec((8, 128), lambda i: (i, 0)),
                   pl.BlockSpec((8, 128), lambda i: (i, 0))),
        compiler_params=pltpu.CompilerParams(
            dimension_semantics=("parallel",)),        # per-block partials: no carry -> v7x
                                                       # can shard rows over both TensorCores
        cost_estimate=pl.CostEstimate(
            flops=2 * n_pad * h * h + 2 * n_pad * h * v,
            transcendentals=n_pad * h + n_pad * v + n_pad,
            bytes_accessed=(2 * n_pad * h + 2 * h * h + 4 * h + 2 * h * v
                            + 8 * n_pad + 2 * nb * 8 * 128 * 4),
        ),
    )(x_p, wd, bd, et, lab_p, msk_p)

    return jnp.sum(loss_parts), jnp.sum(cnt_parts)


# =======================  plain-JAX glue (injected submodule stand-ins)  =======================

def _layer_norm(x, eps=1e-5):
    mu = jnp.mean(x, axis=-1, keepdims=True)
    var = jnp.mean((x - mu) ** 2, axis=-1, keepdims=True)
    return (x - mu) / jnp.sqrt(var + eps)


def _mha(q_in, kv_in, wq, bq, wk, bk, wv, bv, wo, bo, *, attn_bias=None, key_pad_mask=None):
    # q_in: (Tq, B, H) seq-first (PyTorch MHA convention), kv_in: (Tk, B, H)
    Tq, Bq, Hd = q_in.shape
    Tk = kv_in.shape[0]
    dh = Hd // NHEAD
    q = q_in @ wq + bq
    k = kv_in @ wk + bk
    v = kv_in @ wv + bv

    def split(t, L):
        return t.reshape(L, Bq, NHEAD, dh).transpose(1, 2, 0, 3)       # (B, nh, L, dh)

    qh, kh, vh = split(q, Tq), split(k, Tk), split(v, Tk)
    scores = jnp.einsum('bntd,bnsd->bnts', qh, kh) / jnp.sqrt(jnp.float32(dh))
    if attn_bias is not None:
        scores = scores + attn_bias[None, None, :, :]
    if key_pad_mask is not None:                    # True == padded key -> ignore
        scores = jnp.where(key_pad_mask[:, None, None, :], -1e9, scores)
    p = jax.nn.softmax(scores, axis=-1)
    ctx = jnp.einsum('bnts,bnsd->bntd', p, vh)
    ctx = ctx.transpose(2, 0, 1, 3).reshape(Tq, Bq, Hd)
    return ctx @ wo + bo


def decoder_layer(dp, tgt, memory, tgt_mask, mem_key_pad):
    # single post-norm nn.TransformerDecoderLayer stand-in; seq-first layout
    x = tgt
    sa = _mha(x, x, *dp['self_attn'], attn_bias=tgt_mask)
    x = _layer_norm(x + sa)
    ca = _mha(x, memory, *dp['cross_attn'], key_pad_mask=mem_key_pad)
    x = _layer_norm(x + ca)
    ff = jax.nn.relu(x @ dp['ffn_w1'] + dp['ffn_b1']) @ dp['ffn_w2'] + dp['ffn_b2']
    x = _layer_norm(x + ff)
    return x


def _encode_decode(params, source_ids, source_mask, target_ids):
    """encoder + decoder stand-ins; mirrors the reference permutes exactly. Returns (T,B,H)."""
    E = params['word_emb']
    pos = params['pos_emb']
    b, s = source_ids.shape
    t = target_ids.shape[1]

    # encoder stand-in (outputs[0] of the injected encoder)
    enc_emb = E[source_ids] + pos[:s][None, :, :]                      # (B,S,H)
    enc_out = jnp.tanh(enc_emb @ params['enc_w'] + params['enc_b'])    # (B,S,H)
    encoder_output = enc_out.transpose(1, 0, 2)                        # permute([1,0,2]) -> (S,B,H)

    # decoder stand-in
    attn_mask = -10000.0 * (1.0 - jnp.tril(jnp.ones((t, t), jnp.float32)))   # bias[:T,:T]
    tgt_emb = (E[target_ids] + pos[:t][None, :, :]).transpose(1, 0, 2)       # (T,B,H)
    mem_key_pad = source_mask == 0                                           # ~source_mask
    return decoder_layer(params['dec'], tgt_emb, encoder_output, attn_mask, mem_key_pad)


# =======================  Seq2Seq forward (training branch)  =======================

def seq2seq_forward(params, source_ids, source_mask, target_ids, target_mask):
    b = source_ids.shape[0]
    t = target_ids.shape[1]

    out = _encode_decode(params, source_ids, source_mask, target_ids)    # (T,B,H)

    # ---- fused Pallas tail: only the first T-1 positions feed the shifted CE ----
    x = out.transpose(1, 0, 2)[:, :-1, :].reshape(b * (t - 1), H)        # (N, H)
    labels = target_ids[:, 1:].reshape(-1).astype(jnp.int32)             # (N,)
    active = (target_mask[:, 1:] != 0).reshape(-1).astype(jnp.float32)   # (N,)

    loss_sum, count = fused_lmhead_masked_ce(
        x, params['dense_w'], params['dense_b'], params['word_emb'], labels, active)

    loss = loss_sum / jnp.maximum(count, 1.0)            # guard count == 0
    # outputs = (loss, loss * active_loss.sum(), active_loss.sum())
    return loss, loss * count, count


def reference_forward(params, source_ids, source_mask, target_ids, target_mask):
    """plain-JAX f32 reference of the full training branch (for numeric check)."""
    E = params['word_emb']
    out = _encode_decode(params, source_ids, source_mask, target_ids)    # (T,B,H)
    hidden = jnp.tanh(out.transpose(1, 0, 2) @ params['dense_w'] + params['dense_b'])  # (B,T,H)
    lm_logits = hidden @ E.T                                             # (B,T,V)
    shift_logits = lm_logits[:, :-1, :].reshape(-1, V)
    shift_labels = target_ids[:, 1:].reshape(-1)
    msk = (target_mask[:, 1:] != 0).reshape(-1).astype(jnp.float32)
    logp = jax.nn.log_softmax(shift_logits, axis=-1)
    picked = jnp.take_along_axis(logp, shift_labels[:, None], axis=1)[:, 0]
    cnt = jnp.sum(msk)
    loss = jnp.sum(-picked * msk) / jnp.maximum(cnt, 1.0)
    return loss, loss * cnt, cnt


# =======================  deterministic parameter init  =======================

def init_params(key):
    ks = iter(jax.random.split(key, 32))

    def nrm(shape, scale=0.02):
        return (scale * jax.random.normal(next(ks), shape)).astype(jnp.float32)

    def attn_params():
        return (nrm((H, H)), jnp.zeros((1, 1, H), jnp.float32),       # wq, bq
                nrm((H, H)), jnp.zeros((1, 1, H), jnp.float32),       # wk, bk
                nrm((H, H)), jnp.zeros((1, 1, H), jnp.float32),       # wv, bv
                nrm((H, H)), jnp.zeros((1, 1, H), jnp.float32))       # wo, bo

    params = {
        'word_emb': nrm((V, H)),            # encoder.embeddings.word_embeddings (tied lm_head)
        'pos_emb': nrm((MAX_POS, H)),
        'enc_w': nrm((H, H)), 'enc_b': jnp.zeros((H,), jnp.float32),
        'dense_w': nrm((H, H)),             # stored as W^T so kernel does x @ w
        'dense_b': jnp.zeros((1, H), jnp.float32),
        'dec': {
            'self_attn': attn_params(),
            'cross_attn': attn_params(),
            'ffn_w1': nrm((H, FFN)), 'ffn_b1': jnp.zeros((FFN,), jnp.float32),
            'ffn_w2': nrm((FFN, H)), 'ffn_b2': jnp.zeros((H,), jnp.float32),
        },
    }
    return params


# =======================  main  =======================

if __name__ == "__main__":
    key = jax.random.PRNGKey(0)
    kp, k1, k2 = jax.random.split(key, 3)
    params = init_params(kp)

    source_ids = jax.random.randint(k1, (B, S), 0, V, dtype=jnp.int32)
    target_ids = jax.random.randint(k2, (B, T), 0, V, dtype=jnp.int32)
    source_mask = jnp.ones((B, S), jnp.int32).at[1, 6:].set(0)
    target_mask = jnp.ones((B, T), jnp.int32).at[1, 6:].set(0)

    fwd = jax.jit(seq2seq_forward)
    loss, scaled_loss, n_active = fwd(params, source_ids, source_mask, target_ids, target_mask)
    jax.block_until_ready((loss, scaled_loss, n_active))

    # numeric check against a pure-JAX f32 reference of the same forward
    ref_loss, ref_scaled, ref_count = jax.jit(reference_forward)(
        params, source_ids, source_mask, target_ids, target_mask)
    jax.block_until_ready((ref_loss, ref_scaled, ref_count))

    assert loss.shape == () and bool(jnp.isfinite(loss))
    assert jnp.allclose(scaled_loss, loss * n_active, rtol=1e-5, atol=1e-5)
    assert jnp.allclose(n_active, ref_count)
    assert jnp.allclose(loss, ref_loss, rtol=1e-2, atol=1e-2), (loss, ref_loss)
    print("KERNEL_OK")
</pallas_src>

<mosaic_0001>
module attributes {stable_mosaic.version = 11 : i64} {
  func.func @_fused_lmhead_ce_kernel(%arg0: i32, %arg1: memref<16x32xbf16, #tpu.memory_space<vmem>>, %arg2: memref<32x32xbf16, #tpu.memory_space<vmem>>, %arg3: memref<1x32xf32, #tpu.memory_space<vmem>>, %arg4: memref<32x64xbf16, #tpu.memory_space<vmem>>, %arg5: memref<16x1xi32, #tpu.memory_space<vmem>>, %arg6: memref<16x1xf32, #tpu.memory_space<vmem>>, %arg7: memref<8x128xf32, #tpu.memory_space<vmem>>, %arg8: memref<8x128xf32, #tpu.memory_space<vmem>>) attributes {dimension_semantics = [#tpu.dimension_semantics<parallel>], iteration_bounds = array<i64: 1>, scalar_prefetch = 0 : i64, scratch_operands = 0 : i64, tpu.core_type = #tpu.core_type<tc>, window_params = [{transform_indices = @transform_0, window_bounds = array<i64: 16, 32>}, {pipeline_mode = #tpu.pipeline_mode<synchronous>, transform_indices = @transform_1, window_bounds = array<i64: 32, 32>}, {pipeline_mode = #tpu.pipeline_mode<synchronous>, transform_indices = @transform_2, window_bounds = array<i64: 1, 32>}, {pipeline_mode = #tpu.pipeline_mode<synchronous>, transform_indices = @transform_3, window_bounds = array<i64: 32, 64>}, {transform_indices = @transform_4, window_bounds = array<i64: 16, 1>}, {transform_indices = @transform_5, window_bounds = array<i64: 16, 1>}, {transform_indices = @transform_6, window_bounds = array<i64: 8, 128>}, {transform_indices = @transform_7, window_bounds = array<i64: 8, 128>}]} {
    %c0 = arith.constant 0 : index
    %c0_0 = arith.constant 0 : index
    %0 = vector.load %arg1[%c0, %c0_0] : memref<16x32xbf16, #tpu.memory_space<vmem>>, vector<16x32xbf16>
    %c0_1 = arith.constant 0 : index
    %c0_2 = arith.constant 0 : index
    %1 = vector.load %arg2[%c0_1, %c0_2] : memref<32x32xbf16, #tpu.memory_space<vmem>>, vector<32x32xbf16>
    %cst = arith.constant dense<0.000000e+00> : vector<16x32xf32>
    %2 = tpu.matmul %0, %1, %cst {dimension_numbers = #tpu.dot_dimension_numbers<[1], [0], [0], [1], [0, 0, 1, 1], [], []>} : vector<16x32xbf16>, vector<32x32xbf16>, vector<16x32xf32> -> vector<16x32xf32>
    %c0_3 = arith.constant 0 : index
    %c0_4 = arith.constant 0 : index
    %3 = vector.load %arg3[%c0_3, %c0_4] : memref<1x32xf32, #tpu.memory_space<vmem>>, vector<1x32xf32>
    %4 = vector.broadcast %3 : vector<1x32xf32> to vector<16x32xf32>
    %5 = arith.addf %2, %4 : vector<16x32xf32>
    %6 = math.tanh %5 : vector<16x32xf32>
    %7 = arith.truncf %6 : vector<16x32xf32> to vector<16x32xbf16>
    %c0_5 = arith.constant 0 : index
    %c0_6 = arith.constant 0 : index
    %8 = vector.load %arg4[%c0_5, %c0_6] : memref<32x64xbf16, #tpu.memory_space<vmem>>, vector<32x64xbf16>
    %cst_7 = arith.constant dense<0.000000e+00> : vector<16x64xf32>
    %9 = tpu.matmul %7, %8, %cst_7 {dimension_numbers = #tpu.dot_dimension_numbers<[1], [0], [0], [1], [0, 0, 1, 1], [], []>} : vector<16x32xbf16>, vector<32x64xbf16>, vector<16x64xf32> -> vector<16x64xf32>
    %10 = tpu.iota {dimensions = array<i32: 1>} : vector<16x64xi32>
    %cst_8 = arith.constant dense<0xFF800000> : vector<16xf32>
    %11 = vector.multi_reduction <maximumf>, %9, %cst_8 [1] : vector<16x64xf32> to vector<16xf32>
    %12 = vector.shape_cast %11 : vector<16xf32> to vector<16x1xf32>
    %13 = vector.broadcast %12 : vector<16x1xf32> to vector<16x64xf32>
    %14 = arith.subf %9, %13 : vector<16x64xf32>
    %15 = math.exp %14 : vector<16x64xf32>
    %cst_9 = arith.constant dense<0.000000e+00> : vector<16xf32>
    %16 = vector.multi_reduction <add>, %15, %cst_9 [1] : vector<16x64xf32> to vector<16xf32>
    %17 = vector.shape_cast %16 : vector<16xf32> to vector<16x1xf32>
    %18 = math.log %17 : vector<16x1xf32>
    %19 = arith.addf %12, %18 : vector<16x1xf32>
    %c0_10 = arith.constant 0 : index
    %c0_11 = arith.constant 0 : index
    %20 = vector.load %arg5[%c0_10, %c0_11] : memref<16x1xi32, #tpu.memory_space<vmem>>, vector<16x1xi32>
    %21 = vector.broadcast %20 : vector<16x1xi32> to vector<16x64xi32>
    %22 = arith.cmpi eq, %10, %21 : vector<16x64xi32>
    %cst_12 = arith.constant 0.000000e+00 : f32
    %23 = vector.broadcast %cst_12 : f32 to vector<16x64xf32>
    %24 = arith.select %22, %9, %23 : vector<16x64xi1>, vector<16x64xf32>
    %cst_13 = arith.constant dense<0.000000e+00> : vector<16xf32>
    %25 = vector.multi_reduction <add>, %24, %cst_13 [1] : vector<16x64xf32> to vector<16xf32>
    %26 = vector.shape_cast %25 : vector<16xf32> to vector<16x1xf32>
    %c0_14 = arith.constant 0 : index
    %c0_15 = arith.constant 0 : index
    %27 = vector.load %arg6[%c0_14, %c0_15] : memref<16x1xf32, #tpu.memory_space<vmem>>, vector<16x1xf32>
    %28 = arith.subf %19, %26 : vector<16x1xf32>
    %29 = arith.mulf %28, %27 : vector<16x1xf32>
    %30 = vector.shape_cast %29 : vector<16x1xf32> to vector<1x16x1xf32>
    %cst_16 = arith.constant dense<0.000000e+00> : vector<1xf32>
    %31 = vector.multi_reduction <add>, %30, %cst_16 [1, 2] : vector<1x16x1xf32> to vector<1xf32>
    %32 = vector.shape_cast %31 : vector<1xf32> to vector<1x1x1xf32>
    %33 = vector.extract %32[0, 0, 0] : f32 from vector<1x1x1xf32>
    %34 = vector.shape_cast %27 : vector<16x1xf32> to vector<1x16x1xf32>
    %cst_17 = arith.constant dense<0.000000e+00> : vector<1xf32>
    %35 = vector.multi_reduction <add>, %34, %cst_17 [1, 2] : vector<1x16x1xf32> to vector<1xf32>
    %36 = vector.shape_cast %35 : vector<1xf32> to vector<1x1x1xf32>
    %37 = vector.extract %36[0, 0, 0] : f32 from vector<1x1x1xf32>
    %38 = tpu.iota {dimensions = array<i32: 0>} : vector<8x128xi32>
    %39 = tpu.iota {dimensions = array<i32: 1>} : vector<8x128xi32>
    %c0_i32 = arith.constant 0 : i32
    %40 = vector.broadcast %c0_i32 : i32 to vector<8x128xi32>
    %41 = arith.cmpi eq, %38, %40 : vector<8x128xi32>
    %c0_i32_18 = arith.constant 0 : i32
    %42 = vector.broadcast %c0_i32_18 : i32 to vector<8x128xi32>
    %43 = arith.cmpi eq, %39, %42 : vector<8x128xi32>
    %44 = arith.andi %41, %43 : vector<8x128xi1>
    %cst_19 = arith.constant 0.000000e+00 : f32
    %45 = vector.broadcast %33 : f32 to vector<8x128xf32>
    %46 = vector.broadcast %cst_19 : f32 to vector<8x128xf32>
    %47 = arith.select %44, %45, %46 : vector<8x128xi1>, vector<8x128xf32>
    %c0_20 = arith.constant 0 : index
    %c0_21 = arith.constant 0 : index
    %48 = vector.load %arg7[%c0_20, %c0_21] : memref<8x128xf32, #tpu.memory_space<vmem>>, vector<8x128xf32>
    tpu.vector_store %arg7[%c0_20, %c0_21], %47 {strides = array<i32>} : memref<8x128xf32, #tpu.memory_space<vmem>>, vector<8x128xf32>,
    %cst_22 = arith.constant 0.000000e+00 : f32
    %49 = vector.broadcast %37 : f32 to vector<8x128xf32>
    %50 = vector.broadcast %cst_22 : f32 to vector<8x128xf32>
    %51 = arith.select %44, %49, %50 : vector<8x128xi1>, vector<8x128xf32>
    %c0_23 = arith.constant 0 : index
    %c0_24 = arith.constant 0 : index
    %52 = vector.load %arg8[%c0_23, %c0_24] : memref<8x128xf32, #tpu.memory_space<vmem>>, vector<8x128xf32>
    tpu.vector_store %arg8[%c0_23, %c0_24], %51 {strides = array<i32>} : memref<8x128xf32, #tpu.memory_space<vmem>>, vector<8x128xf32>,
    return
  }
  func.func @transform_0(%arg0: i32) -> (i32, i32) {
    %c0_i32 = arith.constant 0 : i32
    %c0_i32_0 = arith.constant 0 : i32
    return %arg0, %c0_i32 : i32, i32
  }
  func.func @transform_1(%arg0: i32) -> (i32, i32) {
    %c0_i32 = arith.constant 0 : i32
    %c0_i32_0 = arith.constant 0 : i32
    %c0_i32_1 = arith.constant 0 : i32
    return %c0_i32, %c0_i32_0 : i32, i32
  }
  func.func @transform_2(%arg0: i32) -> (i32, i32) {
    %c0_i32 = arith.constant 0 : i32
    %c0_i32_0 = arith.constant 0 : i32
    %c0_i32_1 = arith.constant 0 : i32
    return %c0_i32, %c0_i32_0 : i32, i32
  }
  func.func @transform_3(%arg0: i32) -> (i32, i32) {
    %c0_i32 = arith.constant 0 : i32
    %c0_i32_0 = arith.constant 0 : i32
    %c0_i32_1 = arith.constant 0 : i32
    return %c0_i32, %c0_i32_0 : i32, i32
  }
  func.func @transform_4(%arg0: i32) -> (i32, i32) {
    %c0_i32 = arith.constant 0 : i32
    %c0_i32_0 = arith.constant 0 : i32
    return %arg0, %c0_i32 : i32, i32
  }
  func.func @transform_5(%arg0: i32) -> (i32, i32) {
    %c0_i32 = arith.constant 0 : i32
    %c0_i32_0 = arith.constant 0 : i32
    return %arg0, %c0_i32 : i32, i32
  }
  func.func @transform_6(%arg0: i32) -> (i32, i32) {
    %c0_i32 = arith.constant 0 : i32
    %c0_i32_0 = arith.constant 0 : i32
    return %arg0, %c0_i32 : i32, i32
  }
  func.func @transform_7(%arg0: i32) -> (i32, i32) {
    %c0_i32 = arith.constant 0 : i32
    %c0_i32_0 = arith.constant 0 : i32
    return %arg0, %c0_i32 : i32, i32
  }
}

</mosaic_0001>

<bundles_post_ra>
// kernel: seq2seq_forward.1
= control target key start
LH: loop header
LB: loop body
LE: loop exit
PB: predicated region body
PF: predicated region fallthrough
CT: control target
= control target key end

     0   :  { %v315_v0 = vmov 0.0   ;;  %vm316_vm0 = vmmov 0   ;;  %vm56_vm1 = vcmask 261120   ;;  %v317_v6 = vmov 0   ;;  %s409_s1 = inlined_call_operand.vmem [shape: bf16[32,32], index: 1, kind: input, shape index: {}]   ;;  %s410_s0 = inlined_call_operand.vmem [shape: bf16[16,32], index: 0, kind: input, shape index: {}]   ;;  %s411_s3 = inlined_call_operand.vmem [shape: bf16[32,64], index: 3, kind: input, shape index: {}]   ;;  %s412_s4 = inlined_call_operand.vmem [shape: s32[16,1], index: 4, kind: input, shape index: {}]   ;;  %s413_s2 = inlined_call_operand.vmem [shape: f32[1,32], index: 2, kind: input, shape index: {}]   ;;  %s414_s5 = inlined_call_operand.vmem [shape: f32[16,1], index: 5, kind: input, shape index: {}]   ;;  %s415_s6 = inlined_call_operand.vmem [shape: f32[8,128], index: 6, kind: output, shape index: {0}]   ;;  %s416_s7 = inlined_call_operand.vmem [shape: f32[8,128], index: 7, kind: output, shape index: {1}]  }
   0x1   :  { %273 = vmatprep.subr.bf16.mxu0 %v315_v0  ;;  %v298_v1 = vld [vmem:[%s409_s1] sm:$0xff]   ;;  %277 = vmatprep.mubr.msk.bf16.mxu0 %vm316_vm0, %v315_v0  ;;  %v299_v2 = vld [vmem:[%s409_s1 + $0x8] sm:$0xff]   ;;  %vm166_vm2 = vcmask 523264   ;;  %v164_v30 = vlaneseq  ;;  %vm215_vm5 = vcmask 7168  }
   0x2   :  { %281 = vmatprep.subr.bf16.mxu1 %v315_v0  ;;  %285 = vmatprep.mubr.msk.bf16.mxu1 %vm316_vm0, %v315_v0  ;;  %v300_v3 = vld [vmem:[%s410_s0] sm:$0xff]   ;;  %v302_v5 = vld [vmem:[%s411_s3 + $0x8] sm:$0xff]  }
   0x3   :  { %274 = vmatpush3.bf16.msra.mxu0 %v298_v1  ;;  %v301_v4 = vld [vmem:[%s411_s3] sm:$0xff]   ;;  %296 = vset.pattern.permute.xlu1 %v317_v6  ;;  %v192_v8 = vld [vmem:[%s412_s4 + $0x8] sm:$0xff]  ;;  %v387_v33 = vand.u32 127, %v164_v30 }
   0x4   :  { %275 = vmatprep.subr.bf16.mxu0 %v315_v0  ;;  %282 = vmatpush3.bf16.msra.mxu1 %v301_v4  ;;  %v191_v7 = vld [vmem:[%s412_s4] sm:$0xff]  ;;  %v210_v54 = vld [vmem:[%s414_s5 + $0x8] sm:$0xff] }
   0x5   :  { %283 = vmatprep.subr.bf16.mxu1 %v315_v0  ;;  %297 = vset.pattern.permute.xlu0 %v317_v6  ;;  %v259_v9 = vld [vmem:[%s413_s2] ss:$0 sm:$0xff]  ;;  %v229_v62 = vsel %vm215_vm5, %v210_v54, 0.0  ;;  %vm243_vm7 = vcmp.eq.s32.totalorder %v387_v33, 0 }
   0x6   :  { %194 = vperm.xlu1 %296, %v191_v7   ;;  %v209_v52 = vld [vmem:[%s414_s5] sm:$0xff] }
   0x7   :  { %276 = vmatpush3.bf16.msra.mxu0 %v299_v2  ;;  %v228_v61 = vsel %vm215_vm5, %v209_v52, 0.0 }
   0x8   :  { %284 = vmatpush3.bf16.msra.mxu1 %v302_v5  ;;  %v230_v0 = vadd.f32 %v229_v62, %v228_v61 }
   0xa   :  { %278 = vmatmul.mubr.msk.bf16.vlgmr.msra.gmra.mrb[0].mxu0 %vm56_vm1, %v300_v3  ;;  %197 = vperm.xlu1 %296, %v192_v8  }
  0x85   :  { %v195_v32 = vpop.permute.xlu1 %194 }
  0x86   :  { %vm199_vm3 = vcmp.eq.s32.totalorder %v387_v33, %v195_v32 }
  0x89   :  { %v198_v35 = vpop.permute.xlu1 %197 }
  0x8a   :  { %vm200_vm4 = vcmp.eq.s32.totalorder %v387_v33, %v198_v35 }
  0xdd   :  { %v94_v10 = vpop.f32.mrb[0].mxu0 }
  0xde   :  { %v95_v11 = vadd.f32 %v259_v9, %v94_v10  ;;  %v279_v12 = vpop.f32.mrb[1].mxu0 }
  0xdf   :  { %v97_v13 = vpop.f32.mrb[2].mxu0 }
  0xe0   :  { %v98_v14 = vadd.f32 %v259_v9, %v97_v13  ;;  %v280_v15 = vpop.f32.mrb[3].mxu0  ;;  %303 = vtanh.f32 %v95_v11 }
  0xe1   :  { %v241_v15 = vshrl.u32 %v164_v30, 7 }
  0xe2   :  { %305 = vtanh.f32 %v98_v14 }
  0xe3   :  { %vm242_vm6 = vcmp.eq.s32.totalorder %v241_v15, 0 }
  0xe4   :  { %vm244_vm8 = vmand %vm242_vm6, %vm243_vm7 }
  0xea   :  { %v304_v16 = vpop.eup %303 }
  0xec   :  { %v306_v17 = vpop.eup %305 }
  0xed   :  { %v103_v18 = vpack.c.bf16 %v306_v17, %v304_v16 }
  0xef   :  { %286 = vmatmul.mubr.msk.bf16.vlgmr.msra.gmra.mrb[0].mxu1 %vm56_vm1, %v103_v18 }
 0x1c2   :  { %v157_v19 = vpop.f32.mrb[0].mxu1 }
 0x1c3   :  { %v287_v20 = vpop.f32.mrb[1].mxu1  ;;  %v167_v21 = vsel %vm166_vm2, %v157_v19, -inf  ;;  %v201_v37 = vsel %vm199_vm3, %v157_v19, 0.0 }
 0x1c4   :  { %168 = vmax.xlane.f32.xlu0 %v167_v21  ;;  %v160_v22 = vpop.f32.mrb[2].mxu1  ;;  %v203_v39 = vsel %vm166_vm2, %v201_v37, 0.0 }
 0x1c5   :  { %v288_v23 = vpop.f32.mrb[3].mxu1  ;;  %v170_v24 = vsel %vm166_vm2, %v160_v22, -inf  ;;  %v202_v41 = vsel %vm200_vm4, %v160_v22, 0.0 }
 0x1c6   :  { %v206_v42 = vsel %vm166_vm2, %v202_v41, 0.0 }
 0x1c8   :  { %171 = vmax.xlane.f32.xlu0 %v170_v24 }
 0x251   :  { %v169_v25 = vpop.xlane.xlu0 %168 }
 0x252   :  { %v173_v26 = vsub.f32 %v157_v19, %v169_v25 }
 0x254   :  { %v175_v27 = vmul.f32 1.442695, %v173_v26 }
 0x255   :  { %v172_v28 = vpop.xlane.xlu0 %171 }
 0x256   :  { %307 = vpow2.f32 %v175_v27  ;;  %v174_v29 = vsub.f32 %v160_v22, %v172_v28 }
 0x258   :  { %v177_v31 = vmul.f32 1.442695, %v174_v29 }
 0x25a   :  { %309 = vpow2.f32 %v177_v31 }
 0x260   :  { %v308_v34 = vpop.eup %307 }
 0x261   :  { %v179_v36 = vsel %vm166_vm2, %v308_v34, 0.0 }
 0x262   :  { %180 = vadd.xlane.f32.xlu0 %v179_v36 }
 0x264   :  { %v310_v38 = vpop.eup %309 }
 0x265   :  { %v182_v40 = vsel %vm166_vm2, %v310_v38, 0.0 }
 0x266   :  { %204 = vadd.xlane.f32.xlu0 %v203_v39  ;;  %183 = vadd.xlane.f32.xlu1 %v182_v40 }
 0x26a   :  { %207 = vadd.xlane.f32.xlu0 %v206_v42 }
 0x2ef   :  { %v181_v43 = vpop.xlane.xlu0 %180 }
 0x2f0   :  { %311 = vlog2.f32 %v181_v43 }
 0x2f3   :  { %v184_v44 = vpop.xlane.xlu1 %183  ;;  %v205_v47 = vpop.xlane.xlu0 %204 }
 0x2f4   :  { %313 = vlog2.f32 %v184_v44 }
 0x2f7   :  { %v208_v55 = vpop.xlane.xlu0 %207 }
 0x2fa   :  { %v312_v45 = vpop.eup %311 }
 0x2fb   :  { %v186_v46 = vmul.f32 0.6931472, %v312_v45 }
 0x2fd   :  { %v189_v48 = vadd.f32 %v186_v46, %v169_v25 }
 0x2fe   :  { %v314_v49 = vpop.eup %313 }
 0x2ff   :  { %v188_v50 = vmul.f32 0.6931472, %v314_v49  ;;  %v211_v51 = vsub.f32 %v189_v48, %v205_v47 }
 0x301   :  { %v190_v53 = vadd.f32 %v188_v50, %v172_v28  ;;  %v213_v56 = vmul.f32 %v211_v51, %v209_v52 }
 0x303   :  { %v212_v57 = vsub.f32 %v190_v53, %v208_v55  ;;  %v216_v59 = vsel %vm215_vm5, %v213_v56, 0.0 }
 0x305   :  { %v214_v58 = vmul.f32 %v212_v57, %v210_v54 }
 0x307   :  { %v217_v60 = vsel %vm215_vm5, %v214_v58, 0.0 }
 0x308   :  { %v218_v63 = vadd.f32 %v217_v60, %v216_v59 }
 0x30a   :  { %219 = vadd.xlane.f32.xlu0 %v218_v63 }
 0x30e   :  { %231 = vadd.xlane.f32.xlu0 %v230_v0 }
 0x397   :  { %v220_v1 = vpop.xlane.xlu0 %219 }
 0x398   :  { %v221_v2 = vrot.slane %v220_v1, 4 }
 0x39a   :  { %v222_v3 = vadd.f32 %v221_v2, %v220_v1 }
 0x39b   :  { %v232_v4 = vpop.xlane.xlu0 %231 }
 0x39c   :  { %v223_v5 = vrot.slane %v222_v3, 2  ;;  %v233_v6 = vrot.slane %v232_v4, 4 }
 0x39e   :  { %v234_v7 = vadd.f32 %v233_v6, %v232_v4  ;;  %v224_v8 = vadd.f32 %v223_v5, %v222_v3 }
 0x3a0   :  { %v235_v9 = vrot.slane %v234_v7, 2  ;;  %v225_v10 = vrot.slane %v224_v8, 1 }
 0x3a2   :  { %v236_v11 = vadd.f32 %v235_v9, %v234_v7  ;;  %v226_v12 = vadd.f32 %v225_v10, %v224_v8 }
 0x3a4   :  { %289 = vpush %v226_v12  ;;  %v237_v13 = vrot.slane %v236_v11, 1 }
 0x3a6   :  { %v238_v14 = vadd.f32 %v237_v13, %v236_v11 }
 0x3a8   :  { %291 = vpush %v238_v14 }
 0x3d5   :  { %s290_s5 = spop %289 }
 0x3d6   :  { %v245_v16 = vstv %s290_s5 }
 0x3d7   :  { %v246_v17 = vsel %vm244_vm8, %v245_v16, 0.0 }
 0x3d8   :  { %247 = vst [vmem:[%s415_s6] sm:$0xff] %v246_v17 }
 0x3d9   :  { %s292_s18 = spop %291 }
 0x3da   :  { %v248_v18 = vstv %s292_s18 }
 0x3db   :  { %v249_v19 = vsel %vm244_vm8, %v248_v18, 0.0 }
 0x3dc   :  { %250 = vst [vmem:[%s416_s7] sm:$0xff] %v249_v19 }

</bundles_post_ra>
